<compile_context>
chip_gen: v5e
topology: v5e:2x2
jax: 0.10.0
libtpu: 0.0.40
codegen_flags: <defaults>
</compile_context>

<pallas_src>
import functools

import jax
import jax.numpy as jnp
from jax.experimental import pallas as pl
from jax.experimental.pallas import tpu as pltpu


def _round_up(x, m):
    return (x + m - 1) // m * m


def _vmem_budget_bytes():
    """~80% of physical per-core VMEM (generation aware); safe fallback = v7x."""
    phys = None
    try:
        info = pltpu.get_tpu_info()
        for attr in ("vmem_capacity_bytes", "vmem_size_bytes", "vmem_bytes"):
            v = getattr(info, attr, None)
            if v:
                phys = int(v)
                break
    except Exception:
        phys = None
    if not phys:
        phys = 64 * 1024 * 1024  # v7x per-core VMEM (smallest generation) -> safe everywhere
    return int((phys * 4) // 5)


def _choose_tile_m(M, K, Hd, in_bytes, out_bytes, vmem_budget):
    """Largest LHS row-tile whose double-buffered footprint fits the budget.

    Returns (tm, Mpad, grid_m).  Prefers a tm that divides M exactly so the
    M-pad and the post-kernel row slice are structural no-ops (each avoided
    pad/slice saves a full extra HBM pass on this memory-bound op).
    """
    headroom = 4 * 1024 * 1024                    # compiler scratch / MXU staging
    fixed = 2 * K * Hd * in_bytes                 # weight (double-buffered by the pipeliner)
    per_row = 2 * K * in_bytes + 2 * Hd * out_bytes
    avail = vmem_budget - headroom - fixed
    if avail < 8 * per_row:
        # TODO(synk): add a hidden-dim (N) grid split for very large K*Hd weights.
        raise ValueError(
            f"ViTPatchTokenizer kernel: weight (K={K}, Hd={Hd}) leaves no room "
            f"for an 8-row LHS tile within the {vmem_budget >> 20} MiB VMEM budget.")
    tm_budget = min(1024, (avail // per_row) // 8 * 8)
    if M <= tm_budget:
        return M, M, 1                            # single block == full array dims
    t = tm_budget
    while t >= 128:                               # prefer an exact divisor of M
        if M % t == 0:
            return t, M, M // t
        t -= 8
    tm = tm_budget                                # fall back: pad M up to the tile
    Mpad = _round_up(M, tm)
    return tm, Mpad, Mpad // tm


def _proj_kernel(a_ref, w_ref, o_ref):
    """One M-tile of the patch projection: (tm, K) @ (K, Hd) -> (tm, Hd).

    No K grid axis: the full reduction happens in one MXU pass with the weight
    resident in VMEM, so no accumulator scratch / init / finalize is needed.
    """
    o_ref[...] = jnp.dot(
        a_ref[...], w_ref[...], preferred_element_type=jnp.float32
    ).astype(o_ref.dtype)


def _patch_matmul(patches, w_mat, *, tm, grid_m, out_dtype, vmem_limit_bytes):
    """patches: (Mpad, K), w_mat: (K, Hd) -> (Mpad, Hd) via Pallas."""
    Mpad, K = patches.shape
    _, Hd = w_mat.shape

    return pl.pallas_call(
        _proj_kernel,
        out_shape=jax.ShapeDtypeStruct((Mpad, Hd), out_dtype),
        grid_spec=pltpu.PrefetchScalarGridSpec(
            num_scalar_prefetch=0,
            grid=(grid_m,),
            in_specs=[
                # Streaming LHS tile: new block per grid step.
                pl.BlockSpec((tm, K), lambda i: (i, 0)),
                # Weight: constant block index -> fetched once, VMEM-resident.
                # TODO(synk): single-buffer the weight (pipeline_mode=pl.Buffered(1))
                # once that is reliably supported by the auto-pipeliner.
                pl.BlockSpec((K, Hd), lambda i: (0, 0)),
            ],
            out_specs=pl.BlockSpec((tm, Hd), lambda i: (i, 0)),
        ),
        compiler_params=pltpu.CompilerParams(
            dimension_semantics=("parallel",),
            vmem_limit_bytes=vmem_limit_bytes,
        ),
    )(patches, w_mat)


def vit_patch_tokenizer(x, proj_weight, *, patch_size,
                        compute_dtype=jnp.bfloat16, out_dtype=None):
    """Forward pass of ViTPatchTokenizer.

    x:           (B, C, H, W)       NCHW, like PyTorch
    proj_weight: (hidden, C, p, p)  Conv2d weight, bias=False
    returns:     (B, N_patches, hidden), N_patches = (H//p)*(W//p)

    compute_dtype: dtype of the MXU operands (accumulation is always f32).
    out_dtype:     dtype of the emitted tokens (default x.dtype); pass bf16 if
                   downstream consumes bf16 to halve the writeback bandwidth.
    """
    B, C, H, W = x.shape
    hidden = proj_weight.shape[0]
    p = patch_size
    Hp, Wp = H // p, W // p
    N = Hp * Wp
    cdt = jnp.dtype(compute_dtype) if compute_dtype is not None else x.dtype
    odt = jnp.dtype(out_dtype) if out_dtype is not None else x.dtype

    # --- glue (plain JAX): non-overlapping patch extraction in the compute
    # dtype; XLA fuses the cast into the transpose, so this is one HBM pass.
    # TODO(synk): fold this patchify pass into the kernel (BlockSpec over the
    # free (B, C, Hp, p, Wp, p) view + in-VMEM relayout on the XLU) to drop a
    # full M*K HBM write+read; kept in XLA for Mosaic-lowering robustness.
    K = C * p * p
    xc = x.astype(cdt)
    patches = xc.reshape(B, C, Hp, p, Wp, p)
    patches = patches.transpose(0, 2, 4, 1, 3, 5)
    patches = patches.reshape(B * N, K)

    # Conv2d weight (hidden, C, p, p) -> (K, hidden), same (c, kh, kw) order.
    # Tiny tensor; TODO(synk): accept a pre-laid-out (K, Hd) weight to avoid
    # this per-call transpose entirely in a real model.
    w_mat = proj_weight.astype(cdt).reshape(hidden, K)

    # Lane-dense LHS: pad K up to a multiple of 128 (zero cols / zero w rows).
    Kp = _round_up(K, 128)
    if Kp != K:
        patches = jnp.pad(patches, ((0, 0), (0, Kp - K)))
        w_mat = jnp.pad(w_mat, ((0, 0), (0, Kp - K)))
    w_mat = w_mat.T                                   # (Kp, hidden)

    # Lane-dense output: pad hidden up to a multiple of 128 (unmasked vst).
    Hd = _round_up(hidden, 128)
    if Hd != hidden:
        w_mat = jnp.pad(w_mat, ((0, 0), (0, Hd - hidden)))

    M = B * N
    in_bytes = jnp.dtype(cdt).itemsize
    out_bytes = odt.itemsize
    vmem_budget = _vmem_budget_bytes()
    tm, Mpad, grid_m = _choose_tile_m(M, Kp, Hd, in_bytes, out_bytes, vmem_budget)
    if Mpad != M:
        patches = jnp.pad(patches, ((0, Mpad - M), (0, 0)))

    out = _patch_matmul(patches, w_mat, tm=tm, grid_m=grid_m,
                        out_dtype=odt, vmem_limit_bytes=vmem_budget)
    if Mpad != M or Hd != hidden:
        out = out[:M, :hidden]
    return out.reshape(B, N, hidden)


if __name__ == "__main__":
    # Small shapes consistent with the module: patchify conv on NCHW input.
    B, C, S = 2, 4, 16          # batch, in_ch, spatial
    patch_size = 8
    hidden = 32

    key = jax.random.PRNGKey(0)
    kx, kw = jax.random.split(key)
    x = jax.random.normal(kx, (B, C, S, S), dtype=jnp.float32)
    # Deterministic synthetic Conv2d weight (hidden, in_ch, p, p), bias=False.
    proj_weight = jax.random.normal(
        kw, (hidden, C, patch_size, patch_size), dtype=jnp.float32
    ) * 0.02

    # Reference: XLA conv (same semantics as nn.Conv2d forward), then
    # flatten(2).transpose(1, 2).
    ref = jax.lax.conv_general_dilated(
        x, proj_weight,
        window_strides=(patch_size, patch_size),
        padding="VALID",
        dimension_numbers=("NCHW", "OIHW", "NCHW"),
    )
    ref = ref.reshape(B, hidden, -1).transpose(0, 2, 1)

    n_patches = (S // patch_size) ** 2

    # 1) Exact f32 path (tight tolerance).
    fn_f32 = jax.jit(functools.partial(
        vit_patch_tokenizer, patch_size=patch_size, compute_dtype=jnp.float32))
    out_f32 = jax.block_until_ready(fn_f32(x, proj_weight))
    assert out_f32.shape == (B, n_patches, hidden), out_f32.shape
    assert jnp.allclose(out_f32, ref, atol=1e-4, rtol=1e-4), "f32 mismatch vs reference"

    # 2) Default fast path: bf16 operands, f32 accumulation (loose tolerance).
    fn_bf16 = jax.jit(functools.partial(vit_patch_tokenizer, patch_size=patch_size))
    out_bf16 = jax.block_until_ready(fn_bf16(x, proj_weight))
    assert out_bf16.shape == (B, n_patches, hidden), out_bf16.shape
    assert jnp.allclose(out_bf16, ref, atol=2e-2, rtol=0.0), "bf16 mismatch vs reference"

    print("KERNEL_OK")
</pallas_src>

<mosaic_0001>
module attributes {stable_mosaic.version = 11 : i64} {
  func.func @_proj_kernel(%arg0: i32, %arg1: memref<8x256xf32, #tpu.memory_space<vmem>>, %arg2: memref<256x128xf32, #tpu.memory_space<vmem>>, %arg3: memref<8x128xf32, #tpu.memory_space<vmem>>) attributes {dimension_semantics = [#tpu.dimension_semantics<parallel>], iteration_bounds = array<i64: 1>, scalar_prefetch = 0 : i64, scratch_operands = 0 : i64, tpu.core_type = #tpu.core_type<tc>, window_params = [{transform_indices = @transform_0, window_bounds = array<i64: 8, 256>}, {pipeline_mode = #tpu.pipeline_mode<synchronous>, transform_indices = @transform_1, window_bounds = array<i64: 256, 128>}, {transform_indices = @transform_2, window_bounds = array<i64: 8, 128>}]} {
    %c0 = arith.constant 0 : index
    %c0_0 = arith.constant 0 : index
    %0 = vector.load %arg1[%c0, %c0_0] : memref<8x256xf32, #tpu.memory_space<vmem>>, vector<8x256xf32>
    %c0_1 = arith.constant 0 : index
    %c0_2 = arith.constant 0 : index
    %1 = vector.load %arg2[%c0_1, %c0_2] : memref<256x128xf32, #tpu.memory_space<vmem>>, vector<256x128xf32>
    %cst = arith.constant dense<0.000000e+00> : vector<8x128xf32>
    %2 = tpu.matmul %0, %1, %cst {dimension_numbers = #tpu.dot_dimension_numbers<[1], [0], [0], [1], [0, 0, 1, 1], [], []>} : vector<8x256xf32>, vector<256x128xf32>, vector<8x128xf32> -> vector<8x128xf32>
    %c0_3 = arith.constant 0 : index
    %c0_4 = arith.constant 0 : index
    %3 = vector.load %arg3[%c0_3, %c0_4] : memref<8x128xf32, #tpu.memory_space<vmem>>, vector<8x128xf32>
    tpu.vector_store %arg3[%c0_3, %c0_4], %2 {strides = array<i32>} : memref<8x128xf32, #tpu.memory_space<vmem>>, vector<8x128xf32>,
    return
  }
  func.func @transform_0(%arg0: i32) -> (i32, i32) {
    %c0_i32 = arith.constant 0 : i32
    %c0_i32_0 = arith.constant 0 : i32
    return %arg0, %c0_i32 : i32, i32
  }
  func.func @transform_1(%arg0: i32) -> (i32, i32) {
    %c0_i32 = arith.constant 0 : i32
    %c0_i32_0 = arith.constant 0 : i32
    %c0_i32_1 = arith.constant 0 : i32
    return %c0_i32, %c0_i32_0 : i32, i32
  }
  func.func @transform_2(%arg0: i32) -> (i32, i32) {
    %c0_i32 = arith.constant 0 : i32
    %c0_i32_0 = arith.constant 0 : i32
    return %arg0, %c0_i32 : i32, i32
  }
}

</mosaic_0001>

<bundles_post_ra>
// kernel: vit_patch_tokenizer.1
= control target key start
LH: loop header
LB: loop body
LE: loop exit
PB: predicated region body
PF: predicated region fallthrough
CT: control target
= control target key end

     0   :  { %s251_s0 = inlined_call_operand.vmem [shape: f32[8,256], index: 0, kind: input, shape index: {}]   ;;  %s252_s1 = inlined_call_operand.vmem [shape: f32[256,128], index: 1, kind: input, shape index: {}]   ;;  %s253_s2 = inlined_call_operand.hbm [shape: f32[8,128], index: 2, kind: output, shape index: {}]  }
   0x1   :  { %v29_v0 = vld [vmem:[%s252_s1 + $0x78] sm:$0xff]  ;;  %v28_v2 = vld [vmem:[%s252_s1 + $0x70] sm:$0xff]  ;;  %v27_v4 = vld [vmem:[%s252_s1 + $0x68] sm:$0xff] }
   0x2   :  { %v45_v1 = vld [vmem:[%s252_s1 + $0xf8] sm:$0xff]  ;;  %46 = vmatpush.msra.mxu0 %v29_v0  ;;  %v44_v3 = vld [vmem:[%s252_s1 + $0xf0] sm:$0xff]  ;;  %v43_v5 = vld [vmem:[%s252_s1 + $0xe8] sm:$0xff] }
   0x3   :  { %66 = vmatpush.msra.mxu1 %v45_v1  ;;  %v26_v6 = vld [vmem:[%s252_s1 + $0x60] sm:$0xff]  ;;  %v25_v8 = vld [vmem:[%s252_s1 + $0x58] sm:$0xff]  ;;  %v24_v10 = vld [vmem:[%s252_s1 + $0x50] sm:$0xff] }
   0x4   :  { %47 = vmatpush.msra.mxu0 %v28_v2  ;;  %v42_v7 = vld [vmem:[%s252_s1 + $0xe0] sm:$0xff]  ;;  %v41_v9 = vld [vmem:[%s252_s1 + $0xd8] sm:$0xff]  ;;  %v40_v11 = vld [vmem:[%s252_s1 + $0xd0] sm:$0xff] }
   0x5   :  { %67 = vmatpush.msra.mxu1 %v44_v3  ;;  %v23_v12 = vld [vmem:[%s252_s1 + $0x48] sm:$0xff] }
   0x6   :  { %48 = vmatpush.msra.mxu0 %v27_v4  ;;  %v39_v13 = vld [vmem:[%s252_s1 + $0xc8] sm:$0xff] }
   0x7   :  { %68 = vmatpush.msra.mxu1 %v43_v5 }
   0x8   :  { %49 = vmatpush.msra.mxu0 %v26_v6 }
   0x9   :  { %69 = vmatpush.msra.mxu1 %v42_v7 }
   0xa   :  { %50 = vmatpush.msra.mxu0 %v25_v8 }
   0xb   :  { %70 = vmatpush.msra.mxu1 %v41_v9 }
   0xc   :  { %51 = vmatpush.msra.mxu0 %v24_v10 }
   0xd   :  { %71 = vmatpush.msra.mxu1 %v40_v11 }
   0xe   :  { %7 = vsyncpa [#allocation3], 0  ;;  %v22_v14 = vld [vmem:[%s252_s1 + $0x40] sm:$0xff]  ;;  %52 = vmatpush.msra.mxu0 %v23_v12  ;;  %v21_v16 = vld [vmem:[%s252_s1 + $0x38] sm:$0xff]  ;;  %s130_s21 = smov [#allocation2]  }
   0xf   :  { %v38_v15 = vld [vmem:[%s252_s1 + $0xc0] sm:$0xff]  ;;  %72 = vmatpush.msra.mxu1 %v39_v13  ;;  %v37_v17 = vld [vmem:[%s252_s1 + $0xb8] sm:$0xff]  ;;  %v20_v18 = vld [vmem:[%s252_s1 + $0x30] sm:$0xff]  ;;  %s92_s22 = sshll.u32 %s130_s21, 4  ;;  %s93_s22 = int_to_ptr.vmem [resolvable:$true] %s92_s22 }
  0x10   :  { %53 = vmatpush.msra.mxu0 %v22_v14  ;;  %v36_v19 = vld [vmem:[%s252_s1 + $0xb0] sm:$0xff]  ;;  %v19_v20 = vld [vmem:[%s252_s1 + $0x28] sm:$0xff]  ;;  %v18_v22 = vld [vmem:[%s252_s1 + $0x20] sm:$0xff] }
  0x11   :  { %73 = vmatpush.msra.mxu1 %v38_v15  ;;  %v35_v21 = vld [vmem:[%s252_s1 + $0xa8] sm:$0xff]  ;;  %v34_v23 = vld [vmem:[%s252_s1 + $0xa0] sm:$0xff]  ;;  %v17_v24 = vld [vmem:[%s252_s1 + $0x18] sm:$0xff] }
  0x12   :  { %54 = vmatpush.msra.mxu0 %v21_v16  ;;  %v33_v25 = vld [vmem:[%s252_s1 + $0x98] sm:$0xff]  ;;  %v16_v26 = vld [vmem:[%s252_s1 + $0x10] sm:$0xff]  ;;  %v15_v28 = vld [vmem:[%s252_s1 + $0x8] sm:$0xff] }
  0x13   :  { %74 = vmatpush.msra.mxu1 %v37_v17  ;;  %v32_v27 = vld [vmem:[%s252_s1 + $0x90] sm:$0xff]  ;;  %v31_v29 = vld [vmem:[%s252_s1 + $0x88] sm:$0xff]  ;;  %v14_v30 = vld [vmem:[%s252_s1] sm:$0xff] }
  0x14   :  { %55 = vmatpush.msra.mxu0 %v20_v18  ;;  %v30_v31 = vld [vmem:[%s252_s1 + $0x80] sm:$0xff]  ;;  %v13_v33 = vld [vmem:[%s251_s0 + $0x8] sm:$0xff]  ;;  %s94_s1 = sshll.u32 %s253_s2, 4  ;;  %s95_s1 = int_to_ptr.hbm [resolvable:$true] %s94_s1 }
  0x15   :  { %75 = vmatpush.msra.mxu1 %v36_v19  ;;  %v12_v32 = vld [vmem:[%s251_s0] sm:$0xff] }
  0x16   :  { %56 = vmatpush.msra.mxu0 %v19_v20 }
  0x17   :  { %76 = vmatpush.msra.mxu1 %v35_v21 }
  0x18   :  { %57 = vmatpush.msra.mxu0 %v18_v22 }
  0x19   :  { %77 = vmatpush.msra.mxu1 %v34_v23 }
  0x1a   :  { %58 = vmatpush.msra.mxu0 %v17_v24 }
  0x1b   :  { %78 = vmatpush.msra.mxu1 %v33_v25 }
  0x1c   :  { %59 = vmatpush.msra.mxu0 %v16_v26 }
  0x1d   :  { %79 = vmatpush.msra.mxu1 %v32_v27 }
  0x1e   :  { %60 = vmatpush.msra.mxu0 %v15_v28 }
  0x1f   :  { %80 = vmatpush.msra.mxu1 %v31_v29 }
  0x20   :  { %61 = vmatpush.msra.mxu0 %v14_v30 }
  0x21   :  { %81 = vmatpush.msra.mxu1 %v30_v31  ;;  %62 = vmatmul.f32.vlgmr.msra.gmra.mxu0 %v12_v32 }
  0x22   :  { %82 = vmatmul.f32.vlgmr.msra.gmra.mxu1 %v13_v33 }
  0x9e   :  { %v63_v34 = vpop.f32.mrf.mxu0 }
  0x9f   :  { %v83_v35 = vpop.f32.mrf.mxu1 }
  0xa0   :  { %v84_v36 = vadd.f32 %v83_v35, %v63_v34 }
  0xa2   :  { %86 = vst [vmem:[#allocation2] sm:$0xff] %v84_v36 }
  0xa3   :  { %97 = dma.vmem_to_hbm [thread:$0]  %s93_s22, 128, %s95_s1, [#allocation3]  }
  0xa4   :  { %128 = dma.done.wait [#allocation3], 128  }
  0xa5   :  { %129 = vsyncadd [#allocation3], 4294967168 }
  0xa6   :  { %102 = vsyncpa [#allocation3], 1 }

</bundles_post_ra>
